<compile_context>
chip_gen: v7x
topology: tpu7x:2x2x1
jax: 0.10.0
libtpu: 0.0.40
codegen_flags: <defaults>
</compile_context>

<pallas_src>
import jax
import jax.numpy as jnp
from jax import lax
from jax.experimental import pallas as pl
from jax.experimental.pallas import tpu as pltpu

LANES = 128
_CHUNK_ROWS = 512            # in-kernel compute chunk: 256 KiB f32 intermediates
_DEFAULT_BLOCK_ROWS = 8192   # DMA tile: 4 MiB per f32 input (16 MiB double-buffered x2)


def _num_tensorcores():
    """Best-effort TensorCores-per-device (2 on megacore / v7x-class chips)."""
    try:
        dev = jax.devices()[0]
    except Exception:
        return 1
    for attr in ("num_cores", "core_count", "num_tensor_cores"):
        try:
            v = getattr(dev, attr, None)
            if isinstance(v, int) and v > 0:
                return max(1, min(int(v), 2))
        except Exception:
            pass
    kind = str(getattr(dev, "device_kind", "")).lower()
    if any(tag in kind for tag in ("v4", "v5p", "v7")):
        return 2
    return 1


def _make_kernel(*, n_rows, br, chunk, n_inner, binary_targets):
    """n_rows/br/chunk/n_inner are static Python ints baked into the kernel."""
    n_chunks = br // chunk
    rc = chunk // 8

    def kernel(x_ref, t_ref, acc_ref):
        # acc_ref: (3, 8, 128) f32 per-lane partial sums, resident across the
        # inner ("arbitrary") grid axis:
        #   acc_ref[0] : sum(x * t)                 (intersection)
        #   acc_ref[1] : sum(x + t)                 (inputs.sum() + targets.sum())
        #   acc_ref[2] : sum(t*lx + (1-t)*l1x)      (negative BCE numerator)
        o = pl.program_id(0)
        i = pl.program_id(1)

        @pl.when(i == 0)
        def _init():
            acc_ref[...] = jnp.zeros_like(acc_ref)

        # Row offset of this (unclamped) block; used for tail masking.  The
        # index_map clamps fully out-of-range blocks to a valid tile, and the
        # mask below zeroes their contribution.
        block_start = (o * n_inner + i) * br

        def accumulate(masked):
            def body(c, carry):
                a0, a1, a2 = carry
                r0 = pl.multiple_of(c * chunk, chunk)
                xc = x_ref[pl.ds(r0, chunk), :].astype(jnp.float32)
                tc = t_ref[pl.ds(r0, chunk), :].astype(jnp.float32)

                prod = xc * tc
                ssum = xc + tc
                if binary_targets:
                    # Single-log fast path (targets in {0, 1}).
                    p = jnp.where(tc > 0.5, xc, 1.0 - xc)
                    ce = jnp.maximum(jnp.log(p), -100.0)
                else:
                    # PyTorch-style clamp of log outputs at -100, algebraically
                    # rewritten: t*lx + (1-t)*l1x == t*(lx - l1x) + l1x.
                    lx = jnp.maximum(jnp.log(xc), -100.0)
                    l1x = jnp.maximum(jnp.log(1.0 - xc), -100.0)
                    ce = tc * (lx - l1x) + l1x

                if masked:
                    # Select (not multiply): out-of-range rows hold garbage whose
                    # log can be NaN; select discards it exactly.
                    rid = lax.broadcasted_iota(jnp.int32, (chunk, LANES), 0)
                    valid = (block_start + c * chunk + rid) < n_rows
                    zero = jnp.zeros_like(prod)
                    prod = jnp.where(valid, prod, zero)
                    ssum = jnp.where(valid, ssum, zero)
                    ce = jnp.where(valid, ce, zero)

                a0 = a0 + jnp.sum(prod.reshape(rc, 8, LANES), axis=0)
                a1 = a1 + jnp.sum(ssum.reshape(rc, 8, LANES), axis=0)
                a2 = a2 + jnp.sum(ce.reshape(rc, 8, LANES), axis=0)
                return a0, a1, a2

            z = jnp.zeros((8, LANES), jnp.float32)
            a0, a1, a2 = lax.fori_loop(0, n_chunks, body, (z, z, z))
            acc_ref[0] += a0
            acc_ref[1] += a1
            acc_ref[2] += a2

        is_full = (block_start + br) <= n_rows

        @pl.when(is_full)
        def _full():
            accumulate(masked=False)

        @pl.when(jnp.logical_not(is_full))
        def _ragged():
            accumulate(masked=True)

    return kernel


def dice_bce_loss(inputs, targets, weights=None, smooth=1.0, *,
                  block_rows=_DEFAULT_BLOCK_ROWS, num_partials=None,
                  assume_binary_targets=False):
    # TODO(synk): optional per-element `weights` path (weights only modulate the
    # intersection term in the PyTorch module) is not wired into the kernel.
    assert weights is None

    x = inputs.reshape(-1)       # native dtype; kernel casts to f32 per chunk
    t = targets.reshape(-1)
    total_n = x.shape[0]

    rows = pl.cdiv(total_n, LANES)
    if rows >= _CHUNK_ROWS:
        # Large path: no row padding; ragged tail rows are masked in-kernel.
        # The row tile is a multiple of the compute chunk and <= rows.
        n_rows = rows
        br = max(_CHUNK_ROWS, (min(block_rows, rows) // _CHUNK_ROWS) * _CHUNK_ROWS)
        chunk = br if br < _CHUNK_ROWS else _CHUNK_ROWS
    else:
        # Small path: one tile covering all rows, rounded up to 16 sublanes
        # (safe for f32 and bf16); the pad here is at most 16*128 elements.
        n_rows = max(16, ((rows + 15) // 16) * 16)
        br = n_rows
        chunk = br

    # TODO(synk): a total size that is not a multiple of 128 still costs one
    # small pad-copy (a lane-aligned 2-D view needs it); avoiding that would
    # require a manual pl.ANY + DMA path for the final partial row.
    pad = n_rows * LANES - total_n
    if pad:
        # Zero padding is exactly neutral: x=0, t=0 -> prod=0, ssum=0, ce=0
        # (thanks to the -100 log clamp).
        x = jnp.pad(x, (0, pad))
        t = jnp.pad(t, (0, pad))
    x2 = x.reshape(n_rows, LANES)
    t2 = t.reshape(n_rows, LANES)

    n_tiles = pl.cdiv(n_rows, br)
    if num_partials is None:
        num_partials = _num_tensorcores()
    n_outer = max(1, min(int(num_partials), n_tiles))
    n_inner = pl.cdiv(n_tiles, n_outer)

    kernel = _make_kernel(n_rows=n_rows, br=br, chunk=chunk, n_inner=n_inner,
                          binary_targets=assume_binary_targets)

    last_block = n_tiles - 1

    def in_map(o, i):
        # Clamp fully out-of-range steps to a valid tile; the kernel masks them.
        return (jnp.minimum(o * n_inner + i, last_block), 0)

    itemsize = x2.dtype.itemsize
    tile_bytes = br * LANES * itemsize
    vmem_limit = int(min(max(4 * tile_bytes + (8 << 20), 32 << 20), 56 << 20))
    n_elems = n_rows * LANES
    cost = pl.CostEstimate(
        flops=12 * n_elems,
        transcendentals=(1 if assume_binary_targets else 2) * n_elems,
        bytes_accessed=2 * n_elems * itemsize,
    )

    partials = pl.pallas_call(
        kernel,
        out_shape=jax.ShapeDtypeStruct((n_outer * 3, 8, LANES), jnp.float32),
        grid_spec=pltpu.PrefetchScalarGridSpec(
            num_scalar_prefetch=0,
            grid=(n_outer, n_inner),
            in_specs=[
                pl.BlockSpec((br, LANES), in_map),
                pl.BlockSpec((br, LANES), in_map),
            ],
            out_specs=pl.BlockSpec((3, 8, LANES), lambda o, i: (o, 0, 0)),
        ),
        compiler_params=pltpu.CompilerParams(
            dimension_semantics=("parallel", "arbitrary"),
            vmem_limit_bytes=vmem_limit),
        cost_estimate=cost,
    )(x2, t2)

    # Tiny cross-lane / cross-partial reduction + scalar loss math; XLA fuses
    # this into one trailing op.
    sums = jnp.sum(partials.reshape(n_outer, 3, 8, LANES), axis=(0, 2, 3))
    intersection = sums[0]
    sum_xt = sums[1]
    ce_pos = sums[2]             # sum of t*log(x) + (1-t)*log(1-x) (clamped)

    dice_loss = 1.0 - (2.0 * intersection + smooth) / (sum_xt + smooth)
    bce = -ce_pos / total_n
    return bce + dice_loss


def _dice_bce_ref(inputs, targets, smooth=1.0):
    x = inputs.reshape(-1).astype(jnp.float32)
    t = targets.reshape(-1).astype(jnp.float32)
    intersection = jnp.sum(x * t)
    dice_loss = 1.0 - (2.0 * intersection + smooth) / (jnp.sum(x) + jnp.sum(t) + smooth)
    bce = jnp.mean(-(t * jnp.maximum(jnp.log(x), -100.0)
                     + (1.0 - t) * jnp.maximum(jnp.log(1.0 - x), -100.0)))
    return bce + dice_loss


if __name__ == "__main__":
    key = jax.random.PRNGKey(0)
    k1, k2, k3, k4 = jax.random.split(key, 4)

    # Primary test: NCHW-like (batch=2, channels=4, spatial=16x16).
    shape = (2, 4, 16, 16)
    inputs = jax.random.uniform(k1, shape, dtype=jnp.float32, minval=0.0, maxval=1.0)
    targets = (jax.random.uniform(k2, shape, dtype=jnp.float32) > 0.5
               ).astype(jnp.float32)

    loss = jax.block_until_ready(dice_bce_loss(inputs, targets))
    ref = _dice_bce_ref(inputs, targets)
    assert jnp.allclose(loss, ref, rtol=1e-5, atol=1e-5), (loss, ref)

    # Binary-target fast path (single log/element) must match on 0/1 targets.
    loss_bin = jax.block_until_ready(
        dice_bce_loss(inputs, targets, assume_binary_targets=True))
    assert jnp.allclose(loss_bin, ref, rtol=1e-5, atol=1e-5), (loss_bin, ref)

    # Ragged / multi-tile path: 128-unaligned size, forced small tile and 2
    # partials so in-kernel tail masking and the clamped excess step run.
    shape2 = (2, 65895)   # 131790 elements -> 1030 rows (50-elem lane pad)
    inputs2 = jax.random.uniform(k3, shape2, dtype=jnp.float32,
                                 minval=0.0, maxval=1.0)
    targets2 = (jax.random.uniform(k4, shape2, dtype=jnp.float32) > 0.5
                ).astype(jnp.float32)
    loss2 = jax.block_until_ready(
        dice_bce_loss(inputs2, targets2, block_rows=512, num_partials=2))
    ref2 = _dice_bce_ref(inputs2, targets2)
    assert jnp.allclose(loss2, ref2, rtol=1e-5, atol=1e-5), (loss2, ref2)

    print("KERNEL_OK")
</pallas_src>

<mosaic_0001>
module attributes {stable_mosaic.version = 11 : i64} {
  func.func @kernel(%arg0: i32, %arg1: i32, %arg2: memref<16x128xf32, #tpu.memory_space<vmem>>, %arg3: memref<16x128xf32, #tpu.memory_space<vmem>>, %arg4: memref<3x8x128xf32, #tpu.memory_space<vmem>>) attributes {dimension_semantics = [#tpu.dimension_semantics<parallel>, #tpu.dimension_semantics<arbitrary>], iteration_bounds = array<i64: 1, 1>, scalar_prefetch = 0 : i64, scratch_operands = 0 : i64, tpu.core_type = #tpu.core_type<tc>, window_params = [{transform_indices = @transform_0, window_bounds = array<i64: 16, 128>}, {transform_indices = @transform_1, window_bounds = array<i64: 16, 128>}, {transform_indices = @transform_2, window_bounds = array<i64: 3, 8, 128>}]} {
    %c0_i32 = arith.constant 0 : i32
    %0 = arith.cmpi eq, %arg1, %c0_i32 : i32
    %1 = arith.extui %0 : i1 to i32
    %c0_i32_0 = arith.constant 0 : i32
    %2 = arith.cmpi ne, %1, %c0_i32_0 : i32
    scf.if %2 {
      %cst = arith.constant 0.000000e+00 : f32
      %13 = vector.broadcast %cst : f32 to vector<3x8x128xf32>
      %c0 = arith.constant 0 : index
      %c0_5 = arith.constant 0 : index
      %c0_6 = arith.constant 0 : index
      %14 = vector.load %arg4[%c0, %c0_5, %c0_6] : memref<3x8x128xf32, #tpu.memory_space<vmem>>, vector<3x8x128xf32>
      tpu.vector_store %arg4[%c0, %c0_5, %c0_6], %13 {strides = array<i32>} : memref<3x8x128xf32, #tpu.memory_space<vmem>>, vector<3x8x128xf32>,
    } else {
    }
    %c1_i32 = arith.constant 1 : i32
    %3 = arith.muli %arg0, %c1_i32 : i32
    %4 = arith.addi %3, %arg1 : i32
    %c16_i32 = arith.constant 16 : i32
    %5 = arith.muli %4, %c16_i32 : i32
    %c16_i32_1 = arith.constant 16 : i32
    %6 = arith.addi %5, %c16_i32_1 : i32
    %c16_i32_2 = arith.constant 16 : i32
    %7 = arith.cmpi sle, %6, %c16_i32_2 : i32
    %8 = arith.extui %7 : i1 to i32
    %c0_i32_3 = arith.constant 0 : i32
    %9 = arith.cmpi ne, %8, %c0_i32_3 : i32
    scf.if %9 {
      %cst = arith.constant 0.000000e+00 : f32
      %13 = vector.broadcast %cst : f32 to vector<8x128xf32>
      %c0_i32_5 = arith.constant 0 : i32
      %c16_i32_6 = arith.constant 16 : i32
      %14 = arith.muli %c0_i32_5, %c16_i32_6 : i32
      %15 = tpu.assume_multiple %14, 16 : i32
      %16 = arith.index_cast %15 : i32 to index
      %c0 = arith.constant 0 : index
      %17 = vector.load %arg2[%16, %c0] : memref<16x128xf32, #tpu.memory_space<vmem>>, vector<16x128xf32>
      %18 = arith.index_cast %15 : i32 to index
      %c0_7 = arith.constant 0 : index
      %19 = vector.load %arg3[%18, %c0_7] : memref<16x128xf32, #tpu.memory_space<vmem>>, vector<16x128xf32>
      %20 = arith.mulf %17, %19 : vector<16x128xf32>
      %21 = arith.addf %17, %19 : vector<16x128xf32>
      %22 = math.log %17 : vector<16x128xf32>
      %cst_8 = arith.constant -1.000000e+02 : f32
      %23 = vector.broadcast %cst_8 : f32 to vector<16x128xf32>
      %24 = arith.maximumf %22, %23 : vector<16x128xf32>
      %cst_9 = arith.constant 1.000000e+00 : f32
      %25 = vector.broadcast %cst_9 : f32 to vector<16x128xf32>
      %26 = arith.subf %25, %17 : vector<16x128xf32>
      %27 = math.log %26 : vector<16x128xf32>
      %cst_10 = arith.constant -1.000000e+02 : f32
      %28 = vector.broadcast %cst_10 : f32 to vector<16x128xf32>
      %29 = arith.maximumf %27, %28 : vector<16x128xf32>
      %30 = arith.subf %24, %29 : vector<16x128xf32>
      %31 = arith.mulf %19, %30 : vector<16x128xf32>
      %32 = arith.addf %31, %29 : vector<16x128xf32>
      %33 = vector.shape_cast %20 : vector<16x128xf32> to vector<2x8x128xf32>
      %cst_11 = arith.constant dense<0.000000e+00> : vector<8x128xf32>
      %34 = vector.multi_reduction <add>, %33, %cst_11 [0] : vector<2x8x128xf32> to vector<8x128xf32>
      %35 = arith.addf %13, %34 : vector<8x128xf32>
      %36 = vector.shape_cast %21 : vector<16x128xf32> to vector<2x8x128xf32>
      %cst_12 = arith.constant dense<0.000000e+00> : vector<8x128xf32>
      %37 = vector.multi_reduction <add>, %36, %cst_12 [0] : vector<2x8x128xf32> to vector<8x128xf32>
      %38 = arith.addf %13, %37 : vector<8x128xf32>
      %39 = vector.shape_cast %32 : vector<16x128xf32> to vector<2x8x128xf32>
      %cst_13 = arith.constant dense<0.000000e+00> : vector<8x128xf32>
      %40 = vector.multi_reduction <add>, %39, %cst_13 [0] : vector<2x8x128xf32> to vector<8x128xf32>
      %41 = arith.addf %13, %40 : vector<8x128xf32>
      %c1_i32_14 = arith.constant 1 : i32
      %c0_15 = arith.constant 0 : index
      %c0_16 = arith.constant 0 : index
      %c0_17 = arith.constant 0 : index
      %42 = vector.load %arg4[%c0_15, %c0_16, %c0_17] : memref<3x8x128xf32, #tpu.memory_space<vmem>>, vector<1x8x128xf32>
      %43 = vector.shape_cast %42 : vector<1x8x128xf32> to vector<8x128xf32>
      %44 = arith.addf %43, %35 : vector<8x128xf32>
      %c0_18 = arith.constant 0 : index
      %c0_19 = arith.constant 0 : index
      %c0_20 = arith.constant 0 : index
      %45 = vector.load %arg4[%c0_18, %c0_19, %c0_20] : memref<3x8x128xf32, #tpu.memory_space<vmem>>, vector<1x8x128xf32>
      %46 = vector.shape_cast %45 : vector<1x8x128xf32> to vector<8x128xf32>
      %47 = vector.shape_cast %44 : vector<8x128xf32> to vector<1x8x128xf32>
      tpu.vector_store %arg4[%c0_18, %c0_19, %c0_20], %47 {strides = array<i32>} : memref<3x8x128xf32, #tpu.memory_space<vmem>>, vector<1x8x128xf32>,
      %c1 = arith.constant 1 : index
      %c0_21 = arith.constant 0 : index
      %c0_22 = arith.constant 0 : index
      %48 = vector.load %arg4[%c1, %c0_21, %c0_22] : memref<3x8x128xf32, #tpu.memory_space<vmem>>, vector<1x8x128xf32>
      %49 = vector.shape_cast %48 : vector<1x8x128xf32> to vector<8x128xf32>
      %50 = arith.addf %49, %38 : vector<8x128xf32>
      %c1_23 = arith.constant 1 : index
      %c0_24 = arith.constant 0 : index
      %c0_25 = arith.constant 0 : index
      %51 = vector.load %arg4[%c1_23, %c0_24, %c0_25] : memref<3x8x128xf32, #tpu.memory_space<vmem>>, vector<1x8x128xf32>
      %52 = vector.shape_cast %51 : vector<1x8x128xf32> to vector<8x128xf32>
      %53 = vector.shape_cast %50 : vector<8x128xf32> to vector<1x8x128xf32>
      tpu.vector_store %arg4[%c1_23, %c0_24, %c0_25], %53 {strides = array<i32>} : memref<3x8x128xf32, #tpu.memory_space<vmem>>, vector<1x8x128xf32>,
      %c2 = arith.constant 2 : index
      %c0_26 = arith.constant 0 : index
      %c0_27 = arith.constant 0 : index
      %54 = vector.load %arg4[%c2, %c0_26, %c0_27] : memref<3x8x128xf32, #tpu.memory_space<vmem>>, vector<1x8x128xf32>
      %55 = vector.shape_cast %54 : vector<1x8x128xf32> to vector<8x128xf32>
      %56 = arith.addf %55, %41 : vector<8x128xf32>
      %c2_28 = arith.constant 2 : index
      %c0_29 = arith.constant 0 : index
      %c0_30 = arith.constant 0 : index
      %57 = vector.load %arg4[%c2_28, %c0_29, %c0_30] : memref<3x8x128xf32, #tpu.memory_space<vmem>>, vector<1x8x128xf32>
      %58 = vector.shape_cast %57 : vector<1x8x128xf32> to vector<8x128xf32>
      %59 = vector.shape_cast %56 : vector<8x128xf32> to vector<1x8x128xf32>
      tpu.vector_store %arg4[%c2_28, %c0_29, %c0_30], %59 {strides = array<i32>} : memref<3x8x128xf32, #tpu.memory_space<vmem>>, vector<1x8x128xf32>,
    } else {
    }
    %true = arith.constant true
    %10 = arith.xori %7, %true : i1
    %11 = arith.extui %10 : i1 to i32
    %c0_i32_4 = arith.constant 0 : i32
    %12 = arith.cmpi ne, %11, %c0_i32_4 : i32
    scf.if %12 {
      %cst = arith.constant 0.000000e+00 : f32
      %13 = vector.broadcast %cst : f32 to vector<8x128xf32>
      %c0_i32_5 = arith.constant 0 : i32
      %c16_i32_6 = arith.constant 16 : i32
      %14 = arith.muli %c0_i32_5, %c16_i32_6 : i32
      %15 = tpu.assume_multiple %14, 16 : i32
      %16 = arith.index_cast %15 : i32 to index
      %c0 = arith.constant 0 : index
      %17 = vector.load %arg2[%16, %c0] : memref<16x128xf32, #tpu.memory_space<vmem>>, vector<16x128xf32>
      %18 = arith.index_cast %15 : i32 to index
      %c0_7 = arith.constant 0 : index
      %19 = vector.load %arg3[%18, %c0_7] : memref<16x128xf32, #tpu.memory_space<vmem>>, vector<16x128xf32>
      %20 = arith.mulf %17, %19 : vector<16x128xf32>
      %21 = arith.addf %17, %19 : vector<16x128xf32>
      %22 = math.log %17 : vector<16x128xf32>
      %cst_8 = arith.constant -1.000000e+02 : f32
      %23 = vector.broadcast %cst_8 : f32 to vector<16x128xf32>
      %24 = arith.maximumf %22, %23 : vector<16x128xf32>
      %cst_9 = arith.constant 1.000000e+00 : f32
      %25 = vector.broadcast %cst_9 : f32 to vector<16x128xf32>
      %26 = arith.subf %25, %17 : vector<16x128xf32>
      %27 = math.log %26 : vector<16x128xf32>
      %cst_10 = arith.constant -1.000000e+02 : f32
      %28 = vector.broadcast %cst_10 : f32 to vector<16x128xf32>
      %29 = arith.maximumf %27, %28 : vector<16x128xf32>
      %30 = arith.subf %24, %29 : vector<16x128xf32>
      %31 = arith.mulf %19, %30 : vector<16x128xf32>
      %32 = arith.addf %31, %29 : vector<16x128xf32>
      %33 = tpu.iota {dimensions = array<i32: 0>} : vector<16x128xi32>
      %c16_i32_11 = arith.constant 16 : i32
      %34 = arith.muli %c0_i32_5, %c16_i32_11 : i32
      %35 = arith.addi %5, %34 : i32
      %36 = vector.broadcast %35 : i32 to vector<16x128xi32>
      %37 = arith.addi %36, %33 : vector<16x128xi32>
      %c16_i32_12 = arith.constant 16 : i32
      %38 = vector.broadcast %c16_i32_12 : i32 to vector<16x128xi32>
      %39 = arith.cmpi slt, %37, %38 : vector<16x128xi32>
      %cst_13 = arith.constant 0.000000e+00 : f32
      %40 = vector.broadcast %cst_13 : f32 to vector<16x128xf32>
      %41 = arith.select %39, %20, %40 : vector<16x128xi1>, vector<16x128xf32>
      %42 = arith.select %39, %21, %40 : vector<16x128xi1>, vector<16x128xf32>
      %43 = arith.select %39, %32, %40 : vector<16x128xi1>, vector<16x128xf32>
      %44 = vector.shape_cast %41 : vector<16x128xf32> to vector<2x8x128xf32>
      %cst_14 = arith.constant dense<0.000000e+00> : vector<8x128xf32>
      %45 = vector.multi_reduction <add>, %44, %cst_14 [0] : vector<2x8x128xf32> to vector<8x128xf32>
      %46 = arith.addf %13, %45 : vector<8x128xf32>
      %47 = vector.shape_cast %42 : vector<16x128xf32> to vector<2x8x128xf32>
      %cst_15 = arith.constant dense<0.000000e+00> : vector<8x128xf32>
      %48 = vector.multi_reduction <add>, %47, %cst_15 [0] : vector<2x8x128xf32> to vector<8x128xf32>
      %49 = arith.addf %13, %48 : vector<8x128xf32>
      %50 = vector.shape_cast %43 : vector<16x128xf32> to vector<2x8x128xf32>
      %cst_16 = arith.constant dense<0.000000e+00> : vector<8x128xf32>
      %51 = vector.multi_reduction <add>, %50, %cst_16 [0] : vector<2x8x128xf32> to vector<8x128xf32>
      %52 = arith.addf %13, %51 : vector<8x128xf32>
      %c1_i32_17 = arith.constant 1 : i32
      %c0_18 = arith.constant 0 : index
      %c0_19 = arith.constant 0 : index
      %c0_20 = arith.constant 0 : index
      %53 = vector.load %arg4[%c0_18, %c0_19, %c0_20] : memref<3x8x128xf32, #tpu.memory_space<vmem>>, vector<1x8x128xf32>
      %54 = vector.shape_cast %53 : vector<1x8x128xf32> to vector<8x128xf32>
      %55 = arith.addf %54, %46 : vector<8x128xf32>
      %c0_21 = arith.constant 0 : index
      %c0_22 = arith.constant 0 : index
      %c0_23 = arith.constant 0 : index
      %56 = vector.load %arg4[%c0_21, %c0_22, %c0_23] : memref<3x8x128xf32, #tpu.memory_space<vmem>>, vector<1x8x128xf32>
      %57 = vector.shape_cast %56 : vector<1x8x128xf32> to vector<8x128xf32>
      %58 = vector.shape_cast %55 : vector<8x128xf32> to vector<1x8x128xf32>
      tpu.vector_store %arg4[%c0_21, %c0_22, %c0_23], %58 {strides = array<i32>} : memref<3x8x128xf32, #tpu.memory_space<vmem>>, vector<1x8x128xf32>,
      %c1 = arith.constant 1 : index
      %c0_24 = arith.constant 0 : index
      %c0_25 = arith.constant 0 : index
      %59 = vector.load %arg4[%c1, %c0_24, %c0_25] : memref<3x8x128xf32, #tpu.memory_space<vmem>>, vector<1x8x128xf32>
      %60 = vector.shape_cast %59 : vector<1x8x128xf32> to vector<8x128xf32>
      %61 = arith.addf %60, %49 : vector<8x128xf32>
      %c1_26 = arith.constant 1 : index
      %c0_27 = arith.constant 0 : index
      %c0_28 = arith.constant 0 : index
      %62 = vector.load %arg4[%c1_26, %c0_27, %c0_28] : memref<3x8x128xf32, #tpu.memory_space<vmem>>, vector<1x8x128xf32>
      %63 = vector.shape_cast %62 : vector<1x8x128xf32> to vector<8x128xf32>
      %64 = vector.shape_cast %61 : vector<8x128xf32> to vector<1x8x128xf32>
      tpu.vector_store %arg4[%c1_26, %c0_27, %c0_28], %64 {strides = array<i32>} : memref<3x8x128xf32, #tpu.memory_space<vmem>>, vector<1x8x128xf32>,
      %c2 = arith.constant 2 : index
      %c0_29 = arith.constant 0 : index
      %c0_30 = arith.constant 0 : index
      %65 = vector.load %arg4[%c2, %c0_29, %c0_30] : memref<3x8x128xf32, #tpu.memory_space<vmem>>, vector<1x8x128xf32>
      %66 = vector.shape_cast %65 : vector<1x8x128xf32> to vector<8x128xf32>
      %67 = arith.addf %66, %52 : vector<8x128xf32>
      %c2_31 = arith.constant 2 : index
      %c0_32 = arith.constant 0 : index
      %c0_33 = arith.constant 0 : index
      %68 = vector.load %arg4[%c2_31, %c0_32, %c0_33] : memref<3x8x128xf32, #tpu.memory_space<vmem>>, vector<1x8x128xf32>
      %69 = vector.shape_cast %68 : vector<1x8x128xf32> to vector<8x128xf32>
      %70 = vector.shape_cast %67 : vector<8x128xf32> to vector<1x8x128xf32>
      tpu.vector_store %arg4[%c2_31, %c0_32, %c0_33], %70 {strides = array<i32>} : memref<3x8x128xf32, #tpu.memory_space<vmem>>, vector<1x8x128xf32>,
    } else {
    }
    return
  }
  func.func @transform_0(%arg0: i32, %arg1: i32) -> (i32, i32) {
    %c1_i32 = arith.constant 1 : i32
    %0 = arith.muli %arg0, %c1_i32 : i32
    %1 = arith.addi %0, %arg1 : i32
    %c0_i32 = arith.constant 0 : i32
    %2 = arith.minsi %1, %c0_i32 : i32
    %c0_i32_0 = arith.constant 0 : i32
    %c0_i32_1 = arith.constant 0 : i32
    return %2, %c0_i32_0 : i32, i32
  }
  func.func @transform_1(%arg0: i32, %arg1: i32) -> (i32, i32) {
    %c1_i32 = arith.constant 1 : i32
    %0 = arith.muli %arg0, %c1_i32 : i32
    %1 = arith.addi %0, %arg1 : i32
    %c0_i32 = arith.constant 0 : i32
    %2 = arith.minsi %1, %c0_i32 : i32
    %c0_i32_0 = arith.constant 0 : i32
    %c0_i32_1 = arith.constant 0 : i32
    return %2, %c0_i32_0 : i32, i32
  }
  func.func @transform_2(%arg0: i32, %arg1: i32) -> (i32, i32, i32) {
    %c0_i32 = arith.constant 0 : i32
    %c0_i32_0 = arith.constant 0 : i32
    %c0_i32_1 = arith.constant 0 : i32
    return %arg0, %c0_i32, %c0_i32_0 : i32, i32, i32
  }
}

</mosaic_0001>

<bundles_post_ra>
// kernel: tpu_custom_call.1
= control target key start
LH: loop header
LB: loop body
LE: loop exit
PB: predicated region body
PF: predicated region fallthrough
CT: control target
= control target key end

     0   :  { %7 = vsyncpa [#allocation3], 0  ;;  %s355_s0 = inlined_call_operand.hbm [shape: f32[16,128], index: 0, kind: input, shape index: {}]   ;;  %s356_s1 = inlined_call_operand.hbm [shape: f32[16,128], index: 1, kind: input, shape index: {}]   ;;  %s357_s2 = inlined_call_operand.hbm [shape: f32[3,8,128], index: 2, kind: output, shape index: {}]  }
   0x1   :  { %8 = vsyncpa [#allocation6], 0 }
   0x2   :  { %9 = vsyncpa [#allocation4], 0  ;;  %s290_s9 = smov [#allocation2]   ;;  %s218_s13 = scalar_lea.hbm %s355_s0, 256 }
   0x3   :  { %s21_s10 = sshll.u32 %s290_s9, 4  ;;  %p219_p0 = scmp.ne.s32.totalorder %s355_s0, %s218_s13  ;;  %s22_s10 = int_to_ptr.vmem [resolvable:$true] %s21_s10 }
   0x4   :  { %p222_p1 = scmp.lt.u32.totalorder %s218_s13, %s355_s0 }
   0x6   :  { %p224_p2 = pnand %p222_p1, %p219_p0 }
   0x8   :  { %227 = shalt.err (!%p224_p2)
}
   0x9   :  { %s228_s18 = scalar_lea.vmem %s22_s10, 256  ;;  %p233_p4 = scmp.lt.s32.totalorder %s22_s10, %s22_s10 }
   0xa   :  { %p229_p3 = scmp.ne.s32.totalorder %s22_s10, %s228_s18  ;;  %p234_p5 = scmp.lt.s32.totalorder %s228_s18, %s228_s18 }
   0xc   :  { %p235_p6 = por %p234_p5, %p233_p4 }
   0xe   :  { %p236_p7 = pnand %p235_p6, %p229_p3 }
  0x10   :  { %239 = shalt.err (!%p236_p7)
}
  0x11   :  { %s291_s19 = smov 128   ;;  %s292_s20 = smov 8  }
  0x12   :  { %27 = dma.hbm_to_vmem [thread:$0]  %s355_s0, 256, %s22_s10, [#allocation3], %s291_s19, %s291_s19, %s292_s20  }
  0x13   :  { %s293_s23 = smov [#allocation5]   ;;  %s240_s27 = scalar_lea.hbm %s356_s1, 256 }
  0x14   :  { %s39_s24 = sshll.u32 %s293_s23, 4  ;;  %p241_p8 = scmp.ne.s32.totalorder %s356_s1, %s240_s27  ;;  %s40_s24 = int_to_ptr.vmem [resolvable:$true] %s39_s24 }
  0x15   :  { %p244_p9 = scmp.lt.u32.totalorder %s240_s27, %s356_s1 }
  0x17   :  { %p246_p10 = pnand %p244_p9, %p241_p8 }
  0x19   :  { %249 = shalt.err (!%p246_p10)
}
  0x1a   :  { %s250_s4 = scalar_lea.vmem %s40_s24, 256  ;;  %p255_p12 = scmp.lt.s32.totalorder %s40_s24, %s40_s24 }
  0x1b   :  { %p251_p11 = scmp.ne.s32.totalorder %s40_s24, %s250_s4  ;;  %p256_p13 = scmp.lt.s32.totalorder %s250_s4, %s250_s4 }
  0x1d   :  { %p257_p0 = por %p256_p13, %p255_p12 }
  0x1f   :  { %p258_p1 = pnand %p257_p0, %p251_p11 }
  0x21   :  { %261 = shalt.err (!%p258_p1)
}
  0x22   :  { %45 = dma.hbm_to_vmem [thread:$0]  %s356_s1, 256, %s40_s24, [#allocation6], %s291_s19, %s291_s19, %s292_s20  }
  0x23   :  { %284 = dma.done.wait [#allocation3], 256  }
  0x24   :  { %285 = vsyncadd [#allocation3], 4294967040 }
  0x25   :  { %286 = dma.done.wait [#allocation6], 256  }
  0x26   :  { %287 = vsyncadd [#allocation6], 4294967040  ;;  %v74_v0 = vld [vmem:[#allocation2] sm:$0xff]  ;;  %v75_v1 = vld [vmem:[#allocation2 + $0x8] sm:$0xff]  ;;  %s294_s1 = smov [#allocation7]  }
  0x27   :  { %v76_v2 = vld [vmem:[#allocation5] sm:$0xff]  ;;  %v77_v3 = vld [vmem:[#allocation5 + $0x8] sm:$0xff]  ;;  %210 = vlog2.f32 %v74_v0  ;;  %v88_v6 = vsub.f32 1.0, %v74_v0  ;;  %v89_v9 = vsub.f32 1.0, %v75_v1  ;;  %s187_s6 = sshll.u32 %s294_s1, 4  ;;  %s188_s6 = int_to_ptr.vmem [resolvable:$true] %s187_s6 }
  0x28   :  { %v78_v4 = vmul.f32 %v76_v2, %v74_v0  ;;  %v80_v5 = vadd.f32 %v76_v2, %v74_v0  ;;  %v79_v7 = vmul.f32 %v77_v3, %v75_v1  ;;  %212 = vlog2.f32 %v75_v1  ;;  %s262_s7 = scalar_lea.vmem %s188_s6, 384  ;;  %p267_p3 = scmp.lt.s32.totalorder %s188_s6, %s188_s6 }
  0x29   :  { %v81_v8 = vadd.f32 %v77_v3, %v75_v1  ;;  %214 = vlog2.f32 %v88_v6  ;;  %p263_p2 = scmp.ne.s32.totalorder %s188_s6, %s262_s7  ;;  %p268_p4 = scmp.lt.s32.totalorder %s262_s7, %s262_s7 }
  0x2a   :  { %v102_v10 = vadd.f32 %v79_v7, %v78_v4  ;;  %216 = vlog2.f32 %v89_v9 }
  0x2b   :  { %v104_v11 = vadd.f32 %v81_v8, %v80_v5  ;;  %p269_p5 = por %p268_p4, %p267_p3 }
  0x2c   :  { %110 = vst [vmem:[#allocation7] sm:$0xff] %v102_v10 }
  0x2d   :  { %114 = vst [vmem:[#allocation7 + $0x8] sm:$0xff] %v104_v11  ;;  %p270_p6 = pnand %p269_p5, %p263_p2 }
  0x31   :  { %v211_v12 = vpop.eup %210 }
  0x32   :  { %v213_v13 = vpop.eup %212  ;;  %v83_v14 = vmul.f32 0.6931472, %v211_v12 }
  0x33   :  { %v215_v15 = vpop.eup %214  ;;  %v85_v16 = vmul.f32 0.6931472, %v213_v13 }
  0x34   :  { %v217_v17 = vpop.eup %216  ;;  %v86_v18 = vmax.f32 %v83_v14, -100.0  ;;  %v91_v19 = vmul.f32 0.6931472, %v215_v15 }
  0x35   :  { %v87_v20 = vmax.f32 %v85_v16, -100.0  ;;  %v93_v21 = vmul.f32 0.6931472, %v217_v17 }
  0x36   :  { %v94_v22 = vmax.f32 %v91_v19, -100.0 }
  0x37   :  { %v95_v23 = vmax.f32 %v93_v21, -100.0 }
  0x38   :  { %v96_v24 = vsub.f32 %v86_v18, %v94_v22 }
  0x39   :  { %v97_v25 = vsub.f32 %v87_v20, %v95_v23 }
  0x3a   :  { %v98_v26 = vmul.f32 %v96_v24, %v76_v2 }
  0x3b   :  { %v99_v27 = vmul.f32 %v97_v25, %v77_v3 }
  0x3c   :  { %v100_v28 = vadd.f32 %v98_v26, %v94_v22 }
  0x3d   :  { %v101_v29 = vadd.f32 %v99_v27, %v95_v23 }
  0x3f   :  { %v106_v30 = vadd.f32 %v101_v29, %v100_v28 }
  0x41   :  { %118 = vst [vmem:[#allocation7 + $0x10] sm:$0xff] %v106_v30 }
  0x42   :  { %273 = shalt.err (!%p270_p6)
}
  0x43   :  { %s274_s10 = scalar_lea.hbm %s357_s2, 384 }
  0x44   :  { %p275_p7 = scmp.ne.s32.totalorder %s357_s2, %s274_s10  ;;  %p278_p8 = scmp.lt.u32.totalorder %s274_s10, %s357_s2 }
  0x46   :  { %p280_p9 = pnand %p278_p8, %p275_p7 }
  0x48   :  { %283 = shalt.err (!%p280_p9)
}
  0x49   :  { %193 = dma.vmem_to_hbm [thread:$0]  %s188_s6, 384, %s357_s2, [#allocation4], %s291_s19, %s291_s19, %s292_s20  }
  0x4a   :  { %288 = dma.done.wait [#allocation4], 384  }
  0x4b   :  { %289 = vsyncadd [#allocation4], 4294966912 }
  0x4c   :  { %197 = vsyncpa [#allocation3], 1 }
  0x4d   :  { %198 = vsyncpa [#allocation6], 1 }
  0x4e   :  { %199 = vsyncpa [#allocation4], 1 }

</bundles_post_ra>
